<compile_context>
chip_gen: v7x
topology: tpu7x:2x2x1
jax: 0.10.0
libtpu: 0.0.40
codegen_flags: <defaults>
</compile_context>

<pallas_src>
import functools

import jax
import jax.numpy as jnp
from jax.experimental import pallas as pl
from jax.experimental.pallas import tpu as pltpu


def deepsets_kernel(x_ref, w1_ref, b1_ref, w2_ref, b2_ref,
                    wf1_ref, bf1_ref, wf2_ref, bf2_ref, o_ref,
                    *, n_set, d_in):
    bt = x_ref.shape[0]
    h_dim = w1_ref.shape[1]

    # phi layer 1 + permutation-invariant pooling, per set element.
    # x_ref is a lane-dense (bt, N*D_in) tile; slice the lane dim per element
    # (static slices, no reshapes -> no relayout risk).
    w1 = w1_ref[...].astype(x_ref.dtype)     # tiny; no-op when x is f32
    b1 = b1_ref[...]                          # (1, H) f32
    pooled1 = jnp.zeros((bt, h_dim), jnp.float32)
    for n in range(n_set):                    # small static unroll
        xn = x_ref[:, n * d_in:(n + 1) * d_in]                    # (bt, D_in)
        h = jnp.dot(xn, w1, preferred_element_type=jnp.float32) + b1
        pooled1 = pooled1 + jnp.maximum(h, 0.0)                   # f32 (bt, H)

    # phi layer 2 once per batch row (linearity):
    #   sum_n (h_n @ w2 + b2) == (sum_n h_n) @ w2 + N * b2
    pooled = jnp.dot(pooled1, w2_ref[...],
                     preferred_element_type=jnp.float32) + n_set * b2_ref[...]

    # f MLP on the pooled representation (tiny; stays f32).
    g = jnp.maximum(
        jnp.dot(pooled, wf1_ref[...],
                preferred_element_type=jnp.float32) + bf1_ref[...], 0.0)
    out = jnp.dot(g, wf2_ref[...],
                  preferred_element_type=jnp.float32) + bf2_ref[...]

    o_ref[...] = out.astype(o_ref.dtype)      # (bt, D_out)


def deepsets_encoder(x, params, *, block_bytes=2 << 20):
    """x: (B, N, D_in) (f32 or bf16) -> (B, D_out) float32."""
    B, N, D_in = x.shape
    w1, b1, w2, b2, wf1, bf1, wf2, bf2 = params
    H = w1.shape[1]
    D_out = wf2.shape[1]

    # Lane-dense 2-D view of x: (B, N*D_in).  (In a real pipeline the producer
    # would already emit this layout; here the reshape is a one-time cost and
    # removes 16-lane minor-dim inflation from the streaming DMA.)
    x2d = x.reshape(B, N * D_in)

    # ---- batch tile sized by HBM bytes, not MXU fill ----
    itemsize = jnp.dtype(x2d.dtype).itemsize
    row_bytes = N * D_in * itemsize
    b_tile = max(8, block_bytes // row_bytes)      # ~1-2 MiB x block per step
    if B >= 16:
        b_tile = min(b_tile, pl.cdiv(B, 2))        # >= 2 steps -> both v7x TCs
    b_tile = max(8, (b_tile // 8) * 8)             # sublane-aligned block
    if b_tile >= B:
        b_tile = B                                 # block == full dim: always legal
    grid_b = pl.cdiv(B, b_tile)                    # ragged last block, no jnp.pad

    full = lambda b: (0, 0)                        # weights/biases stay resident
    kernel = functools.partial(deepsets_kernel, n_set=N, d_in=D_in)

    flops = 2 * B * (N * D_in * H + H * H + H * H + H * D_out)
    weight_bytes = sum(int(p.size) * jnp.dtype(p.dtype).itemsize for p in params)
    bytes_accessed = B * N * D_in * itemsize + weight_bytes + B * D_out * 4

    # Explicit scoped-VMEM budget: 2x-buffered x blocks + resident weights +
    # 2x-buffered out blocks + f32 intermediates, with headroom; cap for v7x.
    vmem_limit = int(min(
        64 * 1024 * 1024,
        2 * b_tile * row_bytes
        + 2 * weight_bytes
        + 2 * b_tile * D_out * 4
        + 8 * b_tile * max(H, 128) * 4
        + (8 << 20)))
    vmem_limit = max(vmem_limit, 16 * 1024 * 1024)

    out = pl.pallas_call(
        kernel,
        out_shape=jax.ShapeDtypeStruct((B, D_out), jnp.float32),
        grid_spec=pltpu.PrefetchScalarGridSpec(
            num_scalar_prefetch=0,
            grid=(grid_b,),
            in_specs=[
                pl.BlockSpec((b_tile, N * D_in), lambda b: (b, 0)),  # x (streams)
                pl.BlockSpec((D_in, H), full),                        # w1
                pl.BlockSpec((1, H), full),                           # b1
                pl.BlockSpec((H, H), full),                           # w2
                pl.BlockSpec((1, H), full),                           # b2
                pl.BlockSpec((H, H), full),                           # wf1
                pl.BlockSpec((1, H), full),                           # bf1
                pl.BlockSpec((H, D_out), full),                       # wf2
                pl.BlockSpec((1, D_out), full),                       # bf2
            ],
            out_specs=pl.BlockSpec((b_tile, D_out), lambda b: (b, 0)),
        ),
        compiler_params=pltpu.CompilerParams(
            dimension_semantics=("parallel",),
            vmem_limit_bytes=vmem_limit),
        cost_estimate=pl.CostEstimate(
            flops=flops, transcendentals=0, bytes_accessed=int(bytes_accessed)),
    )(x2d, w1, b1, w2, b2, wf1, bf1, wf2, bf2)

    return out[:B]


def reference(x, params):
    """Pure-JAX reference mirroring the PyTorch forward."""
    w1, b1, w2, b2, wf1, bf1, wf2, bf2 = params
    h = jnp.maximum(x @ w1 + b1, 0.0) @ w2 + b2      # phi(x): (B, N, H)
    pooled = h.sum(axis=-2)                          # sum over dim=-2: (B, H)
    g = jnp.maximum(pooled @ wf1 + bf1, 0.0)
    return g @ wf2 + bf2                             # f(pooled): (B, D_out)


def _make_inputs(key, B, N, D_in, H, D_out):
    ks = jax.random.split(key, 9)
    x = jax.random.normal(ks[0], (B, N, D_in), dtype=jnp.float32)
    scale = 0.1
    params = (
        scale * jax.random.normal(ks[1], (D_in, H), dtype=jnp.float32),   # w1
        scale * jax.random.normal(ks[2], (1, H), dtype=jnp.float32),      # b1
        scale * jax.random.normal(ks[3], (H, H), dtype=jnp.float32),      # w2
        scale * jax.random.normal(ks[4], (1, H), dtype=jnp.float32),      # b2
        scale * jax.random.normal(ks[5], (H, H), dtype=jnp.float32),      # wf1
        scale * jax.random.normal(ks[6], (1, H), dtype=jnp.float32),      # bf1
        scale * jax.random.normal(ks[7], (H, D_out), dtype=jnp.float32),  # wf2
        scale * jax.random.normal(ks[8], (1, D_out), dtype=jnp.float32),  # bf2
    )
    return x, params


if __name__ == "__main__":
    B, N, D_in, H, D_out = 2, 8, 16, 32, 32
    key = jax.random.PRNGKey(0)

    # --- main check: small batch (single grid step), f32, vs. reference ---
    x, params = _make_inputs(key, B, N, D_in, H, D_out)
    out = jax.block_until_ready(deepsets_encoder(x, params))
    ref = reference(x, params)
    assert out.shape == (B, D_out)
    assert jnp.allclose(out, ref, atol=1e-4, rtol=1e-4), "mismatch vs reference (f32)"

    # --- multi-step grid with a ragged final block (no padding): B=40,
    #     b_tile=16 -> grid=(3,), last block rows 40..47 are OOB/discarded ---
    B2 = 40
    x2, params2 = _make_inputs(jax.random.PRNGKey(1), B2, N, D_in, H, D_out)
    out2 = jax.block_until_ready(deepsets_encoder(x2, params2))
    ref2 = reference(x2, params2)
    assert out2.shape == (B2, D_out)
    assert jnp.allclose(out2, ref2, atol=1e-4, rtol=1e-4), "mismatch vs reference (tiled/ragged)"

    # --- bf16 x in HBM (cast at the producer): halves the dominant HBM
    #     traffic; f32 accumulation, looser tolerance ---
    x_bf16 = x.astype(jnp.bfloat16)
    out_bf16 = jax.block_until_ready(deepsets_encoder(x_bf16, params))
    assert jnp.allclose(out_bf16, ref, atol=1e-1, rtol=1e-1), "mismatch vs reference (bf16)"

    print("KERNEL_OK")
</pallas_src>

<mosaic_0001>
module attributes {stable_mosaic.version = 11 : i64} {
  func.func @deepsets_kernel(%arg0: i32, %arg1: memref<2x128xf32, #tpu.memory_space<vmem>>, %arg2: memref<16x32xf32, #tpu.memory_space<vmem>>, %arg3: memref<1x32xf32, #tpu.memory_space<vmem>>, %arg4: memref<32x32xf32, #tpu.memory_space<vmem>>, %arg5: memref<1x32xf32, #tpu.memory_space<vmem>>, %arg6: memref<32x32xf32, #tpu.memory_space<vmem>>, %arg7: memref<1x32xf32, #tpu.memory_space<vmem>>, %arg8: memref<32x32xf32, #tpu.memory_space<vmem>>, %arg9: memref<1x32xf32, #tpu.memory_space<vmem>>, %arg10: memref<2x32xf32, #tpu.memory_space<vmem>>) attributes {dimension_semantics = [#tpu.dimension_semantics<parallel>], iteration_bounds = array<i64: 1>, scalar_prefetch = 0 : i64, scratch_operands = 0 : i64, tpu.core_type = #tpu.core_type<tc>, window_params = [{transform_indices = @transform_0, window_bounds = array<i64: 2, 128>}, {pipeline_mode = #tpu.pipeline_mode<synchronous>, transform_indices = @transform_1, window_bounds = array<i64: 16, 32>}, {pipeline_mode = #tpu.pipeline_mode<synchronous>, transform_indices = @transform_2, window_bounds = array<i64: 1, 32>}, {pipeline_mode = #tpu.pipeline_mode<synchronous>, transform_indices = @transform_3, window_bounds = array<i64: 32, 32>}, {pipeline_mode = #tpu.pipeline_mode<synchronous>, transform_indices = @transform_4, window_bounds = array<i64: 1, 32>}, {pipeline_mode = #tpu.pipeline_mode<synchronous>, transform_indices = @transform_5, window_bounds = array<i64: 32, 32>}, {pipeline_mode = #tpu.pipeline_mode<synchronous>, transform_indices = @transform_6, window_bounds = array<i64: 1, 32>}, {pipeline_mode = #tpu.pipeline_mode<synchronous>, transform_indices = @transform_7, window_bounds = array<i64: 32, 32>}, {pipeline_mode = #tpu.pipeline_mode<synchronous>, transform_indices = @transform_8, window_bounds = array<i64: 1, 32>}, {transform_indices = @transform_9, window_bounds = array<i64: 2, 32>}]} {
    %c0 = arith.constant 0 : index
    %c0_0 = arith.constant 0 : index
    %0 = vector.load %arg2[%c0, %c0_0] : memref<16x32xf32, #tpu.memory_space<vmem>>, vector<16x32xf32>
    %c0_1 = arith.constant 0 : index
    %c0_2 = arith.constant 0 : index
    %1 = vector.load %arg3[%c0_1, %c0_2] : memref<1x32xf32, #tpu.memory_space<vmem>>, vector<1x32xf32>
    %cst = arith.constant 0.000000e+00 : f32
    %2 = vector.broadcast %cst : f32 to vector<2x32xf32>
    %c0_3 = arith.constant 0 : index
    %c0_4 = arith.constant 0 : index
    %3 = vector.load %arg1[%c0_3, %c0_4] : memref<2x128xf32, #tpu.memory_space<vmem>>, vector<2x16xf32>
    %cst_5 = arith.constant dense<0.000000e+00> : vector<2x32xf32>
    %4 = tpu.matmul %3, %0, %cst_5 {dimension_numbers = #tpu.dot_dimension_numbers<[1], [0], [0], [1], [0, 0, 1, 1], [], []>} : vector<2x16xf32>, vector<16x32xf32>, vector<2x32xf32> -> vector<2x32xf32>
    %5 = vector.broadcast %1 : vector<1x32xf32> to vector<2x32xf32>
    %6 = arith.addf %4, %5 : vector<2x32xf32>
    %cst_6 = arith.constant 0.000000e+00 : f32
    %7 = vector.broadcast %cst_6 : f32 to vector<2x32xf32>
    %8 = arith.maximumf %6, %7 : vector<2x32xf32>
    %9 = arith.addf %2, %8 : vector<2x32xf32>
    %c0_7 = arith.constant 0 : index
    %c16 = arith.constant 16 : index
    %10 = vector.load %arg1[%c0_7, %c16] : memref<2x128xf32, #tpu.memory_space<vmem>>, vector<2x16xf32>
    %cst_8 = arith.constant dense<0.000000e+00> : vector<2x32xf32>
    %11 = tpu.matmul %10, %0, %cst_8 {dimension_numbers = #tpu.dot_dimension_numbers<[1], [0], [0], [1], [0, 0, 1, 1], [], []>} : vector<2x16xf32>, vector<16x32xf32>, vector<2x32xf32> -> vector<2x32xf32>
    %12 = vector.broadcast %1 : vector<1x32xf32> to vector<2x32xf32>
    %13 = arith.addf %11, %12 : vector<2x32xf32>
    %cst_9 = arith.constant 0.000000e+00 : f32
    %14 = vector.broadcast %cst_9 : f32 to vector<2x32xf32>
    %15 = arith.maximumf %13, %14 : vector<2x32xf32>
    %16 = arith.addf %9, %15 : vector<2x32xf32>
    %c0_10 = arith.constant 0 : index
    %c32 = arith.constant 32 : index
    %17 = vector.load %arg1[%c0_10, %c32] : memref<2x128xf32, #tpu.memory_space<vmem>>, vector<2x16xf32>
    %cst_11 = arith.constant dense<0.000000e+00> : vector<2x32xf32>
    %18 = tpu.matmul %17, %0, %cst_11 {dimension_numbers = #tpu.dot_dimension_numbers<[1], [0], [0], [1], [0, 0, 1, 1], [], []>} : vector<2x16xf32>, vector<16x32xf32>, vector<2x32xf32> -> vector<2x32xf32>
    %19 = vector.broadcast %1 : vector<1x32xf32> to vector<2x32xf32>
    %20 = arith.addf %18, %19 : vector<2x32xf32>
    %cst_12 = arith.constant 0.000000e+00 : f32
    %21 = vector.broadcast %cst_12 : f32 to vector<2x32xf32>
    %22 = arith.maximumf %20, %21 : vector<2x32xf32>
    %23 = arith.addf %16, %22 : vector<2x32xf32>
    %c0_13 = arith.constant 0 : index
    %c48 = arith.constant 48 : index
    %24 = vector.load %arg1[%c0_13, %c48] : memref<2x128xf32, #tpu.memory_space<vmem>>, vector<2x16xf32>
    %cst_14 = arith.constant dense<0.000000e+00> : vector<2x32xf32>
    %25 = tpu.matmul %24, %0, %cst_14 {dimension_numbers = #tpu.dot_dimension_numbers<[1], [0], [0], [1], [0, 0, 1, 1], [], []>} : vector<2x16xf32>, vector<16x32xf32>, vector<2x32xf32> -> vector<2x32xf32>
    %26 = vector.broadcast %1 : vector<1x32xf32> to vector<2x32xf32>
    %27 = arith.addf %25, %26 : vector<2x32xf32>
    %cst_15 = arith.constant 0.000000e+00 : f32
    %28 = vector.broadcast %cst_15 : f32 to vector<2x32xf32>
    %29 = arith.maximumf %27, %28 : vector<2x32xf32>
    %30 = arith.addf %23, %29 : vector<2x32xf32>
    %c0_16 = arith.constant 0 : index
    %c64 = arith.constant 64 : index
    %31 = vector.load %arg1[%c0_16, %c64] : memref<2x128xf32, #tpu.memory_space<vmem>>, vector<2x16xf32>
    %cst_17 = arith.constant dense<0.000000e+00> : vector<2x32xf32>
    %32 = tpu.matmul %31, %0, %cst_17 {dimension_numbers = #tpu.dot_dimension_numbers<[1], [0], [0], [1], [0, 0, 1, 1], [], []>} : vector<2x16xf32>, vector<16x32xf32>, vector<2x32xf32> -> vector<2x32xf32>
    %33 = vector.broadcast %1 : vector<1x32xf32> to vector<2x32xf32>
    %34 = arith.addf %32, %33 : vector<2x32xf32>
    %cst_18 = arith.constant 0.000000e+00 : f32
    %35 = vector.broadcast %cst_18 : f32 to vector<2x32xf32>
    %36 = arith.maximumf %34, %35 : vector<2x32xf32>
    %37 = arith.addf %30, %36 : vector<2x32xf32>
    %c0_19 = arith.constant 0 : index
    %c80 = arith.constant 80 : index
    %38 = vector.load %arg1[%c0_19, %c80] : memref<2x128xf32, #tpu.memory_space<vmem>>, vector<2x16xf32>
    %cst_20 = arith.constant dense<0.000000e+00> : vector<2x32xf32>
    %39 = tpu.matmul %38, %0, %cst_20 {dimension_numbers = #tpu.dot_dimension_numbers<[1], [0], [0], [1], [0, 0, 1, 1], [], []>} : vector<2x16xf32>, vector<16x32xf32>, vector<2x32xf32> -> vector<2x32xf32>
    %40 = vector.broadcast %1 : vector<1x32xf32> to vector<2x32xf32>
    %41 = arith.addf %39, %40 : vector<2x32xf32>
    %cst_21 = arith.constant 0.000000e+00 : f32
    %42 = vector.broadcast %cst_21 : f32 to vector<2x32xf32>
    %43 = arith.maximumf %41, %42 : vector<2x32xf32>
    %44 = arith.addf %37, %43 : vector<2x32xf32>
    %c0_22 = arith.constant 0 : index
    %c96 = arith.constant 96 : index
    %45 = vector.load %arg1[%c0_22, %c96] : memref<2x128xf32, #tpu.memory_space<vmem>>, vector<2x16xf32>
    %cst_23 = arith.constant dense<0.000000e+00> : vector<2x32xf32>
    %46 = tpu.matmul %45, %0, %cst_23 {dimension_numbers = #tpu.dot_dimension_numbers<[1], [0], [0], [1], [0, 0, 1, 1], [], []>} : vector<2x16xf32>, vector<16x32xf32>, vector<2x32xf32> -> vector<2x32xf32>
    %47 = vector.broadcast %1 : vector<1x32xf32> to vector<2x32xf32>
    %48 = arith.addf %46, %47 : vector<2x32xf32>
    %cst_24 = arith.constant 0.000000e+00 : f32
    %49 = vector.broadcast %cst_24 : f32 to vector<2x32xf32>
    %50 = arith.maximumf %48, %49 : vector<2x32xf32>
    %51 = arith.addf %44, %50 : vector<2x32xf32>
    %c0_25 = arith.constant 0 : index
    %c112 = arith.constant 112 : index
    %52 = vector.load %arg1[%c0_25, %c112] : memref<2x128xf32, #tpu.memory_space<vmem>>, vector<2x16xf32>
    %cst_26 = arith.constant dense<0.000000e+00> : vector<2x32xf32>
    %53 = tpu.matmul %52, %0, %cst_26 {dimension_numbers = #tpu.dot_dimension_numbers<[1], [0], [0], [1], [0, 0, 1, 1], [], []>} : vector<2x16xf32>, vector<16x32xf32>, vector<2x32xf32> -> vector<2x32xf32>
    %54 = vector.broadcast %1 : vector<1x32xf32> to vector<2x32xf32>
    %55 = arith.addf %53, %54 : vector<2x32xf32>
    %cst_27 = arith.constant 0.000000e+00 : f32
    %56 = vector.broadcast %cst_27 : f32 to vector<2x32xf32>
    %57 = arith.maximumf %55, %56 : vector<2x32xf32>
    %58 = arith.addf %51, %57 : vector<2x32xf32>
    %c0_28 = arith.constant 0 : index
    %c0_29 = arith.constant 0 : index
    %59 = vector.load %arg4[%c0_28, %c0_29] : memref<32x32xf32, #tpu.memory_space<vmem>>, vector<32x32xf32>
    %cst_30 = arith.constant dense<0.000000e+00> : vector<2x32xf32>
    %60 = tpu.matmul %58, %59, %cst_30 {dimension_numbers = #tpu.dot_dimension_numbers<[1], [0], [0], [1], [0, 0, 1, 1], [], []>} : vector<2x32xf32>, vector<32x32xf32>, vector<2x32xf32> -> vector<2x32xf32>
    %c0_31 = arith.constant 0 : index
    %c0_32 = arith.constant 0 : index
    %61 = vector.load %arg5[%c0_31, %c0_32] : memref<1x32xf32, #tpu.memory_space<vmem>>, vector<1x32xf32>
    %cst_33 = arith.constant 8.000000e+00 : f32
    %62 = vector.broadcast %cst_33 : f32 to vector<1x32xf32>
    %63 = arith.mulf %62, %61 : vector<1x32xf32>
    %64 = vector.broadcast %63 : vector<1x32xf32> to vector<2x32xf32>
    %65 = arith.addf %60, %64 : vector<2x32xf32>
    %c0_34 = arith.constant 0 : index
    %c0_35 = arith.constant 0 : index
    %66 = vector.load %arg6[%c0_34, %c0_35] : memref<32x32xf32, #tpu.memory_space<vmem>>, vector<32x32xf32>
    %cst_36 = arith.constant dense<0.000000e+00> : vector<2x32xf32>
    %67 = tpu.matmul %65, %66, %cst_36 {dimension_numbers = #tpu.dot_dimension_numbers<[1], [0], [0], [1], [0, 0, 1, 1], [], []>} : vector<2x32xf32>, vector<32x32xf32>, vector<2x32xf32> -> vector<2x32xf32>
    %c0_37 = arith.constant 0 : index
    %c0_38 = arith.constant 0 : index
    %68 = vector.load %arg7[%c0_37, %c0_38] : memref<1x32xf32, #tpu.memory_space<vmem>>, vector<1x32xf32>
    %69 = vector.broadcast %68 : vector<1x32xf32> to vector<2x32xf32>
    %70 = arith.addf %67, %69 : vector<2x32xf32>
    %cst_39 = arith.constant 0.000000e+00 : f32
    %71 = vector.broadcast %cst_39 : f32 to vector<2x32xf32>
    %72 = arith.maximumf %70, %71 : vector<2x32xf32>
    %c0_40 = arith.constant 0 : index
    %c0_41 = arith.constant 0 : index
    %73 = vector.load %arg8[%c0_40, %c0_41] : memref<32x32xf32, #tpu.memory_space<vmem>>, vector<32x32xf32>
    %cst_42 = arith.constant dense<0.000000e+00> : vector<2x32xf32>
    %74 = tpu.matmul %72, %73, %cst_42 {dimension_numbers = #tpu.dot_dimension_numbers<[1], [0], [0], [1], [0, 0, 1, 1], [], []>} : vector<2x32xf32>, vector<32x32xf32>, vector<2x32xf32> -> vector<2x32xf32>
    %c0_43 = arith.constant 0 : index
    %c0_44 = arith.constant 0 : index
    %75 = vector.load %arg9[%c0_43, %c0_44] : memref<1x32xf32, #tpu.memory_space<vmem>>, vector<1x32xf32>
    %76 = vector.broadcast %75 : vector<1x32xf32> to vector<2x32xf32>
    %77 = arith.addf %74, %76 : vector<2x32xf32>
    %c0_45 = arith.constant 0 : index
    %c0_46 = arith.constant 0 : index
    %78 = vector.load %arg10[%c0_45, %c0_46] : memref<2x32xf32, #tpu.memory_space<vmem>>, vector<2x32xf32>
    tpu.vector_store %arg10[%c0_45, %c0_46], %77 {strides = array<i32>} : memref<2x32xf32, #tpu.memory_space<vmem>>, vector<2x32xf32>,
    return
  }
  func.func @transform_0(%arg0: i32) -> (i32, i32) {
    %c0_i32 = arith.constant 0 : i32
    %c0_i32_0 = arith.constant 0 : i32
    return %arg0, %c0_i32 : i32, i32
  }
  func.func @transform_1(%arg0: i32) -> (i32, i32) {
    %c0_i32 = arith.constant 0 : i32
    %c0_i32_0 = arith.constant 0 : i32
    %c0_i32_1 = arith.constant 0 : i32
    return %c0_i32, %c0_i32_0 : i32, i32
  }
  func.func @transform_2(%arg0: i32) -> (i32, i32) {
    %c0_i32 = arith.constant 0 : i32
    %c0_i32_0 = arith.constant 0 : i32
    %c0_i32_1 = arith.constant 0 : i32
    return %c0_i32, %c0_i32_0 : i32, i32
  }
  func.func @transform_3(%arg0: i32) -> (i32, i32) {
    %c0_i32 = arith.constant 0 : i32
    %c0_i32_0 = arith.constant 0 : i32
    %c0_i32_1 = arith.constant 0 : i32
    return %c0_i32, %c0_i32_0 : i32, i32
  }
  func.func @transform_4(%arg0: i32) -> (i32, i32) {
    %c0_i32 = arith.constant 0 : i32
    %c0_i32_0 = arith.constant 0 : i32
    %c0_i32_1 = arith.constant 0 : i32
    return %c0_i32, %c0_i32_0 : i32, i32
  }
  func.func @transform_5(%arg0: i32) -> (i32, i32) {
    %c0_i32 = arith.constant 0 : i32
    %c0_i32_0 = arith.constant 0 : i32
    %c0_i32_1 = arith.constant 0 : i32
    return %c0_i32, %c0_i32_0 : i32, i32
  }
  func.func @transform_6(%arg0: i32) -> (i32, i32) {
    %c0_i32 = arith.constant 0 : i32
    %c0_i32_0 = arith.constant 0 : i32
    %c0_i32_1 = arith.constant 0 : i32
    return %c0_i32, %c0_i32_0 : i32, i32
  }
  func.func @transform_7(%arg0: i32) -> (i32, i32) {
    %c0_i32 = arith.constant 0 : i32
    %c0_i32_0 = arith.constant 0 : i32
    %c0_i32_1 = arith.constant 0 : i32
    return %c0_i32, %c0_i32_0 : i32, i32
  }
  func.func @transform_8(%arg0: i32) -> (i32, i32) {
    %c0_i32 = arith.constant 0 : i32
    %c0_i32_0 = arith.constant 0 : i32
    %c0_i32_1 = arith.constant 0 : i32
    return %c0_i32, %c0_i32_0 : i32, i32
  }
  func.func @transform_9(%arg0: i32) -> (i32, i32) {
    %c0_i32 = arith.constant 0 : i32
    %c0_i32_0 = arith.constant 0 : i32
    return %arg0, %c0_i32 : i32, i32
  }
}

</mosaic_0001>

<bundles_post_ra>
// kernel: tpu_custom_call.1
= control target key start
LH: loop header
LB: loop body
LE: loop exit
PB: predicated region body
PF: predicated region fallthrough
CT: control target
= control target key end

     0   :  { %14 = vsyncpa [#allocation3], 0  ;;  %s1544_s0 = inlined_call_operand.hbm [shape: f32[2,128], index: 0, kind: input, shape index: {}]   ;;  %s1545_s1 = inlined_call_operand.hbm [shape: f32[16,32], index: 1, kind: input, shape index: {}]   ;;  %s1546_s2 = inlined_call_operand.vmem [shape: f32[1,32], index: 2, kind: input, shape index: {}]   ;;  %s1547_s3 = inlined_call_operand.hbm [shape: f32[32,32], index: 3, kind: input, shape index: {}]   ;;  %s1548_s4 = inlined_call_operand.vmem [shape: f32[1,32], index: 4, kind: input, shape index: {}]   ;;  %s1549_s5 = inlined_call_operand.hbm [shape: f32[32,32], index: 5, kind: input, shape index: {}]   ;;  %s1550_s6 = inlined_call_operand.vmem [shape: f32[1,32], index: 6, kind: input, shape index: {}]   ;;  %s1551_s7 = inlined_call_operand.hbm [shape: f32[32,32], index: 7, kind: input, shape index: {}]   ;;  %s1552_s8 = inlined_call_operand.vmem [shape: f32[1,32], index: 8, kind: input, shape index: {}]   ;;  %s1553_s9 = inlined_call_operand.hbm [shape: f32[2,32], index: 9, kind: output, shape index: {}]  }
   0x1   :  { %15 = vsyncpa [#allocation6], 0 }
   0x2   :  { %16 = vsyncpa [#allocation9], 0 }
   0x3   :  { %17 = vsyncpa [#allocation4], 0  ;;  %s1333_s30 = smov [#allocation5]   ;;  %s1193_s13 = scalar_lea.hbm %s1545_s1, 256 }
   0x4   :  { %s33_s10 = sshll.u32 %s1333_s30, 4  ;;  %p1194_p0 = scmp.ne.s32.totalorder %s1545_s1, %s1193_s13  ;;  %s34_s10 = int_to_ptr.vmem [resolvable:$true] %s33_s10 }
   0x5   :  { %p1197_p1 = scmp.lt.u32.totalorder %s1193_s13, %s1545_s1 }
   0x7   :  { %p1199_p2 = pnand %p1197_p1, %p1194_p0 }
   0x9   :  { %1202 = shalt.err (!%p1199_p2)
}
   0xa   :  { %s1203_s18 = scalar_lea.vmem %s34_s10, 256  ;;  %p1208_p4 = scmp.lt.s32.totalorder %s34_s10, %s34_s10 }
   0xb   :  { %p1204_p3 = scmp.ne.s32.totalorder %s34_s10, %s1203_s18  ;;  %p1209_p5 = scmp.lt.s32.totalorder %s1203_s18, %s1203_s18 }
   0xd   :  { %p1210_p6 = por %p1209_p5, %p1208_p4 }
   0xf   :  { %p1211_p7 = pnand %p1210_p6, %p1204_p3 }
  0x11   :  { %1214 = shalt.err (!%p1211_p7)
}
  0x12   :  { %s1334_s19 = smov 128   ;;  %s1335_s20 = smov 8  }
  0x13   :  { %39 = dma.hbm_to_vmem [thread:$0]  %s1545_s1, 256, %s34_s10, [#allocation6], %s1334_s19, %s1334_s19, %s1335_s20  }
  0x14   :  { %s1336_s23 = smov [#allocation8]   ;;  %s1337_s25 = smov [#allocation2]  }
  0x15   :  { %s61_s24 = sshll.u32 %s1336_s23, 4  ;;  %s24_s26 = sshll.u32 %s1337_s25, 4  ;;  %s62_s24 = int_to_ptr.vmem [resolvable:$true] %s61_s24  ;;  %s25_s26 = int_to_ptr.vmem [resolvable:$true] %s24_s26 }
  0x16   :  { %s1215_s29 = scalar_lea.hbm %s1549_s5, 512 }
  0x17   :  { %p1216_p8 = scmp.ne.s32.totalorder %s1549_s5, %s1215_s29  ;;  %p1219_p9 = scmp.lt.u32.totalorder %s1215_s29, %s1549_s5 }
  0x19   :  { %p1221_p10 = pnand %p1219_p9, %p1216_p8 }
  0x1b   :  { %1224 = shalt.err (!%p1221_p10)
}
  0x1c   :  { %s1225_s1 = scalar_lea.vmem %s62_s24, 512  ;;  %p1230_p12 = scmp.lt.s32.totalorder %s62_s24, %s62_s24 }
  0x1d   :  { %p1226_p11 = scmp.ne.s32.totalorder %s62_s24, %s1225_s1  ;;  %p1231_p13 = scmp.lt.s32.totalorder %s1225_s1, %s1225_s1 }
  0x1f   :  { %p1232_p0 = por %p1231_p13, %p1230_p12 }
  0x21   :  { %p1233_p1 = pnand %p1232_p0, %p1226_p11 }
  0x23   :  { %1236 = shalt.err (!%p1233_p1)
}
  0x24   :  { %67 = dma.hbm_to_vmem [thread:$0]  %s1549_s5, 512, %s62_s24, [#allocation9], %s1334_s19, %s1334_s19, %s1335_s20  }
  0x25   :  { %s1237_s17 = scalar_lea.hbm %s1544_s0, 32 }
  0x26   :  { %p1238_p2 = scmp.ne.s32.totalorder %s1544_s0, %s1237_s17  ;;  %p1241_p3 = scmp.lt.u32.totalorder %s1237_s17, %s1544_s0 }
  0x28   :  { %p1243_p4 = pnand %p1241_p3, %p1238_p2 }
  0x2a   :  { %1246 = shalt.err (!%p1243_p4)
}
  0x2b   :  { %s1247_s25 = scalar_lea.vmem %s25_s26, 32  ;;  %p1252_p6 = scmp.lt.s32.totalorder %s25_s26, %s25_s26 }
  0x2c   :  { %p1248_p5 = scmp.ne.s32.totalorder %s25_s26, %s1247_s25  ;;  %p1253_p7 = scmp.lt.s32.totalorder %s1247_s25, %s1247_s25 }
  0x2e   :  { %p1254_p8 = por %p1253_p7, %p1252_p6 }
  0x30   :  { %p1255_p9 = pnand %p1254_p8, %p1248_p5 }
  0x32   :  { %1258 = shalt.err (!%p1255_p9)
}
  0x33   :  { %27 = dma.hbm_to_vmem [thread:$0]  %s1544_s0, 32, %s25_s26, [#allocation3]  }
  0x34   :  { %s1338_s27 = smov [#allocation7]   ;;  %s1339_s29 = smov [#allocation10]  }
  0x35   :  { %s47_s28 = sshll.u32 %s1338_s27, 4  ;;  %s75_s30 = sshll.u32 %s1339_s29, 4  ;;  %s48_s28 = int_to_ptr.vmem [resolvable:$true] %s47_s28  ;;  %s76_s30 = int_to_ptr.vmem [resolvable:$true] %s75_s30 }
  0x36   :  { %s1259_s13 = scalar_lea.hbm %s1547_s3, 512 }
  0x37   :  { %p1260_p10 = scmp.ne.s32.totalorder %s1547_s3, %s1259_s13  ;;  %p1263_p11 = scmp.lt.u32.totalorder %s1259_s13, %s1547_s3 }
  0x39   :  { %p1265_p12 = pnand %p1263_p11, %p1260_p10 }
  0x3b   :  { %1268 = shalt.err (!%p1265_p12)
}
  0x3c   :  { %s1269_s0 = scalar_lea.vmem %s48_s28, 512  ;;  %p1274_p0 = scmp.lt.s32.totalorder %s48_s28, %s48_s28 }
  0x3d   :  { %p1270_p13 = scmp.ne.s32.totalorder %s48_s28, %s1269_s0  ;;  %p1275_p1 = scmp.lt.s32.totalorder %s1269_s0, %s1269_s0 }
  0x3f   :  { %p1276_p2 = por %p1275_p1, %p1274_p0 }
  0x41   :  { %p1277_p3 = pnand %p1276_p2, %p1270_p13 }
  0x43   :  { %1280 = shalt.err (!%p1277_p3)
}
  0x44   :  { %53 = dma.hbm_to_vmem [thread:$0]  %s1547_s3, 512, %s48_s28, [#allocation6], %s1334_s19, %s1334_s19, %s1335_s20  }
  0x45   :  { %s1281_s21 = scalar_lea.hbm %s1551_s7, 512 }
  0x46   :  { %p1282_p4 = scmp.ne.s32.totalorder %s1551_s7, %s1281_s21  ;;  %p1285_p5 = scmp.lt.u32.totalorder %s1281_s21, %s1551_s7 }
  0x48   :  { %p1287_p6 = pnand %p1285_p5, %p1282_p4 }
  0x4a   :  { %1290 = shalt.err (!%p1287_p6)
}
  0x4b   :  { %s1291_s24 = scalar_lea.vmem %s76_s30, 512  ;;  %p1296_p8 = scmp.lt.s32.totalorder %s76_s30, %s76_s30 }
  0x4c   :  { %p1292_p7 = scmp.ne.s32.totalorder %s76_s30, %s1291_s24  ;;  %p1297_p9 = scmp.lt.s32.totalorder %s1291_s24, %s1291_s24 }
  0x4e   :  { %p1298_p10 = por %p1297_p9, %p1296_p8 }
  0x50   :  { %p1299_p11 = pnand %p1298_p10, %p1292_p7 }
  0x52   :  { %1302 = shalt.err (!%p1299_p11)
}
  0x53   :  { %81 = dma.hbm_to_vmem [thread:$0]  %s1551_s7, 512, %s76_s30, [#allocation9], %s1334_s19, %s1334_s19, %s1335_s20  }
  0x54   :  { %1325 = dma.done.wait [#allocation3], 32  }
  0x55   :  { %1326 = vsyncadd [#allocation3], 4294967264 }
  0x56   :  { %1327 = dma.done.wait [#allocation6], 768  }
  0x57   :  { %1328 = vsyncadd [#allocation6], 4294966528 }
  0x58   :  { %1329 = dma.done.wait [#allocation9], 1024  }
  0x59   :  { %1330 = vsyncadd [#allocation9], 4294966272  ;;  %v1340_v0 = vmov 0.0|0.0   ;;  %vm1341_vm0 = vmmov 0   ;;  %v1342_v1 = vmov 0.0   ;;  %v99_v3 = vld [vmem:[#allocation5] sm:$0xff] }
  0x5a   :  { %1133 = vmatprep.subr.bf16.mxu1 %v1340_v0  ;;  %1139 = vmatprep.subr.bf16.mxu0 %v1340_v0  ;;  %v102_v2 = vld [vmem:[#allocation2] sm:$0x3]  ;;  %v100_v4 = vld [vmem:[#allocation5 + $0x8] sm:$0xff]  ;;  %s1343_s7 = smov 112   ;;  %s1344_s19 = smov 80   ;;  %vm109_vm1 = vcmask 130048  }
  0x5b   :  { %1048 = vmatprep.mubr.msk.f32.mxu1 %vm1341_vm0, %v1342_v1  ;;  %1062 = vmatprep.mubr.msk.f32.mxu0 %vm1341_vm0, %v1342_v1  ;;  %v1134_v5 = vpack.c.bf16 %v100_v4, %v99_v3  ;;  %s1345_s20 = smov 96   ;;  %s1346_s28 = smov 64   ;;  %v717_v13 = vld [vmem:[#allocation7] sm:$0xff]  ;;  %v718_v14 = vld [vmem:[#allocation7 + $0x8] sm:$0xff]  ;;  %v719_v16 = vld [vmem:[#allocation7 + $0x10] sm:$0xff]  ;;  %vm729_vm2 = vcmask 261120  }
  0x5c   :  { %185 = vrot.lane.b32.xlu0 %v102_v2, %s1343_s7  ;;  %337 = vrot.lane.b32.xlu1 %v102_v2, %s1344_s19  ;;  %s1347_s29 = smov 48   ;;  %s1348_s30 = smov 32   ;;  %v1158_v15 = vpack.c.bf16 %v718_v14, %v717_v13  ;;  %v720_v17 = vld [vmem:[#allocation7 + $0x18] sm:$0xff]  ;;  %v803_v21 = vld [vmem:[#allocation8] sm:$0xff]  ;;  %v804_v22 = vld [vmem:[#allocation8 + $0x8] sm:$0xff]  ;;  %vm972_vm3 = vcmask 254976  }
  0x5d   :  { %1135 = vmatpush3.bf16.msra.mxu1 %v1134_v5  ;;  %1141 = vmatpush3.bf16.msra.mxu0 %v1134_v5  ;;  %s1349_s11 = smov 16   ;;  %v1161_v18 = vpack.c.bf16 %v720_v17, %v719_v16  ;;  %v1164_v23 = vpack.c.bf16 %v804_v22, %v803_v21  ;;  %v991_v24 = vld [vmem:[%s1546_s2] ss:$0 sm:$0xff]  ;;  %v805_v62 = vld [vmem:[#allocation8 + $0x10] sm:$0xff]  ;;  %v806_v63 = vld [vmem:[#allocation8 + $0x18] sm:$0xff]  ;;  %s1350_s0 = smov [#allocation11]  }
  0x5e   :  { %1136 = vmatprep.subr.bf16.mxu1 %v1340_v0  ;;  %1145 = vmatprep.subr.bf16.mxu0 %v1340_v0  ;;  %v888_v3 = vld [vmem:[#allocation10] sm:$0xff]  ;;  %v889_v4 = vld [vmem:[#allocation10 + $0x8] sm:$0xff]  ;;  %v890_v14 = vld [vmem:[#allocation10 + $0x10] sm:$0xff]  ;;  %s980_s26 = sshll.u32 %s1350_s0, 4  ;;  %s981_s26 = int_to_ptr.vmem [resolvable:$true] %s980_s26 }
  0x5f   :  { %v1003_v21 = vld [vmem:[%s1552_s8] ss:$0 sm:$0xff]  ;;  %s1303_s16 = scalar_lea.vmem %s981_s26, 32  ;;  %p1308_p13 = scmp.lt.s32.totalorder %s981_s26, %s981_s26 }
  0x60   :  { %261 = vrot.lane.b32.xlu0 %v102_v2, %s1345_s20  ;;  %413 = vrot.lane.b32.xlu1 %v102_v2, %s1346_s28  ;;  %p1304_p12 = scmp.ne.s32.totalorder %s981_s26, %s1303_s16  ;;  %p1309_p0 = scmp.lt.s32.totalorder %s1303_s16, %s1303_s16 }
  0x61   :  { %1049 = vmatmul.mubr.msk.f32.vlgmr.msra.gmra.mrb[0].mxu1 %vm109_vm1, %v102_v2 }
  0x62   :  { %1138 = vmatpush3.bf16.msra.mxu1 %v1134_v5  ;;  %1055 = vmatprep.mubr.msk.f32.mxu1 %vm1341_vm0, %v1342_v1  ;;  %p1310_p1 = por %p1309_p0, %p1308_p13 }
  0x63   :  { %1142 = vmatprep.subr.bf16.mxu1 %v1340_v0 }
  0x64   :  { %489 = vrot.lane.b32.xlu0 %v102_v2, %s1347_s29  ;;  %565 = vrot.lane.b32.xlu1 %v102_v2, %s1348_s30  ;;  %p1311_p2 = pnand %p1310_p1, %p1304_p12 }
  0x68   :  { %641 = vrot.lane.b32.xlu0 %v102_v2, %s1349_s11  ;;  %v1167_v2 = vpack.c.bf16 %v806_v63, %v805_v62 }
  0xce   :  { %v186_v6 = vpop.permute.xlu0 %185  ;;  %v338_v7 = vpop.permute.xlu1 %337 }
  0xcf   :  { %1056 = vmatmul.mubr.msk.f32.vlgmr.msra.gmra.mrb[2].mxu1 %vm109_vm1, %v186_v6  ;;  %v724_v6 = vlaneseq }
  0xd0   :  { %1144 = vmatpush3.bf16.msra.mxu1 %v1134_v5  ;;  %1069 = vmatprep.mubr.msk.f32.mxu1 %vm1341_vm0, %v1342_v1 }
  0xd1   :  { %1148 = vmatprep.subr.bf16.mxu1 %v1340_v0 }
  0xd2   :  { %v262_v8 = vpop.permute.xlu0 %261  ;;  %v414_v9 = vpop.permute.xlu1 %413 }
  0xd3   :  { %1063 = vmatmul.mubr.msk.f32.vlgmr.msra.gmra.mrb[0].mxu0 %vm109_vm1, %v262_v8  ;;  %1070 = vmatmul.mubr.msk.f32.vlgmr.msra.gmra.mrb[4].mxu1 %vm109_vm1, %v338_v7  ;;  %v725_v7 = vshrl.u32 %v724_v6, 7  ;;  %v721_v8 = vld [vmem:[%s1548_s4] sm:$0x1] }
  0xd4   :  { %1147 = vmatpush3.bf16.msra.mxu0 %v1134_v5  ;;  %1150 = vmatpush3.bf16.msra.mxu1 %v1134_v5 }
  0xd5   :  { %1076 = vmatprep.mubr.msk.f32.mxu0 %vm1341_vm0, %v1342_v1  ;;  %1151 = vmatprep.subr.bf16.mxu0 %v1340_v0 }
  0xd6   :  { %v490_v10 = vpop.permute.xlu0 %489  ;;  %1083 = vmatprep.mubr.msk.f32.mxu1 %vm1341_vm0, %v1342_v1  ;;  %1154 = vmatprep.subr.bf16.mxu1 %v1340_v0  ;;  %v566_v11 = vpop.permute.xlu1 %565 }
  0xd7   :  { %1077 = vmatmul.mubr.msk.f32.vlgmr.msra.gmra.mrb[2].mxu0 %vm109_vm1, %v414_v9  ;;  %1084 = vmatmul.mubr.msk.f32.vlgmr.msra.gmra.mrb[6].mxu1 %vm109_vm1, %v490_v10  ;;  %v722_v9 = vmul.f32 8.0, %v721_v8  ;;  %v726_v10 = vsub.s32 0, %v725_v7 }
  0xd8   :  { %1153 = vmatpush3.bf16.msra.mxu0 %v1134_v5  ;;  %1156 = vmatpush3.bf16.msra.mxu1 %v1134_v5  ;;  %v1170_v5 = vpack.c.bf16 %v889_v4, %v888_v3 }
  0xd9   :  { %1090 = vmatprep.mubr.msk.f32.mxu0 %vm1341_vm0, %v1342_v1  ;;  %1097 = vmatprep.mubr.msk.f32.mxu1 %vm1341_vm0, %v1342_v1 }
  0xda   :  { %v642_v12 = vpop.permute.xlu0 %641  ;;  %1157 = vmatprep.subr.bf16.mxu0 %v1340_v0  ;;  %1163 = vmatprep.subr.bf16.mxu1 %v1340_v0 }
  0xdb   :  { %1091 = vmatmul.mubr.msk.f32.vlgmr.msra.gmra.mrb[4].mxu0 %vm109_vm1, %v566_v11  ;;  %1098 = vmatmul.mubr.msk.f32.vlgmr.msra.gmra.mrb[8].mxu1 %vm109_vm1, %v642_v12  ;;  %v727_v11 = vrot.slane %v722_v9, %v726_v10 }
  0xdc   :  { %1108 = vmatprep.mubr.msk.f32.mxu0 %vm1341_vm0, %v1342_v1  ;;  %1119 = vmatprep.mubr.msk.f32.mxu1 %vm1341_vm0, %v1342_v1 }
  0xdd   :  { %1159 = vmatpush3.bf16.msra.mxu0 %v1158_v15  ;;  %1165 = vmatpush3.bf16.msra.mxu1 %v1164_v23  ;;  %v891_v15 = vld [vmem:[#allocation10 + $0x18] sm:$0xff] }
  0xde   :  { %1160 = vmatprep.subr.bf16.mxu0 %v1340_v0  ;;  %1166 = vmatprep.subr.bf16.mxu1 %v1340_v0  ;;  %v1173_v16 = vpack.c.bf16 %v891_v15, %v890_v14 }
  0xe1   :  { %1162 = vmatpush3.bf16.msra.mxu0 %v1161_v18  ;;  %1168 = vmatpush3.bf16.msra.mxu1 %v1167_v2 }
  0xe2   :  { %1169 = vmatprep.subr.bf16.mxu0 %v1340_v0 }
 0x134   :  { %v179_v19 = vpop.f32.mrb[0].mxu1 }
 0x135   :  { %v1050_v20 = vpop.f32.mrb[1].mxu1  ;;  %v180_v25 = vadd.f32 %v991_v24, %v179_v19 }
 0x137   :  { %v183_v29 = vmax.f32 %v180_v25, 0.0 }
 0x1a2   :  { %v255_v26 = vpop.f32.mrb[2].mxu1 }
 0x1a3   :  { %v256_v27 = vadd.f32 %v991_v24, %v255_v26  ;;  %v1057_v28 = vpop.f32.mrb[3].mxu1 }
 0x1a5   :  { %v259_v30 = vmax.f32 %v256_v27, 0.0 }
 0x1a6   :  { %v331_v31 = vpop.f32.mrb[0].mxu0  ;;  %v407_v32 = vpop.f32.mrb[4].mxu1 }
 0x1a7   :  { %v260_v33 = vadd.f32 %v259_v30, %v183_v29  ;;  %v332_v34 = vadd.f32 %v991_v24, %v331_v31  ;;  %v408_v35 = vadd.f32 %v991_v24, %v407_v32  ;;  %v1064_v36 = vpop.f32.mrb[1].mxu0  ;;  %v1071_v37 = vpop.f32.mrb[5].mxu1 }
 0x1a9   :  { %v335_v38 = vmax.f32 %v332_v34, 0.0  ;;  %v411_v42 = vmax.f32 %v408_v35, 0.0 }
 0x1aa   :  { %v483_v39 = vpop.f32.mrb[2].mxu0  ;;  %v559_v40 = vpop.f32.mrb[6].mxu1 }
 0x1ab   :  { %v336_v41 = vadd.f32 %v335_v38, %v260_v33  ;;  %v484_v43 = vadd.f32 %v991_v24, %v483_v39  ;;  %v1078_v44 = vpop.f32.mrb[3].mxu0  ;;  %v560_v45 = vadd.f32 %v991_v24, %v559_v40  ;;  %v1085_v46 = vpop.f32.mrb[7].mxu1 }
 0x1ad   :  { %v412_v47 = vadd.f32 %v411_v42, %v336_v41  ;;  %v487_v48 = vmax.f32 %v484_v43, 0.0  ;;  %v563_v49 = vmax.f32 %v560_v45, 0.0 }
 0x1ae   :  { %v635_v50 = vpop.f32.mrb[4].mxu0  ;;  %v711_v51 = vpop.f32.mrb[8].mxu1 }
 0x1af   :  { %v488_v52 = vadd.f32 %v487_v48, %v412_v47  ;;  %v636_v53 = vadd.f32 %v991_v24, %v635_v50  ;;  %v1092_v54 = vpop.f32.mrb[5].mxu0  ;;  %v712_v55 = vadd.f32 %v991_v24, %v711_v51  ;;  %v1099_v56 = vpop.f32.mrb[9].mxu1 }
 0x1b1   :  { %v564_v57 = vadd.f32 %v563_v49, %v488_v52  ;;  %v639_v58 = vmax.f32 %v636_v53, 0.0  ;;  %v715_v59 = vmax.f32 %v712_v55, 0.0 }
 0x1b3   :  { %v640_v60 = vadd.f32 %v639_v58, %v564_v57 }
 0x1b5   :  { %v716_v61 = vadd.f32 %v715_v59, %v640_v60 }
 0x1b7   :  { %1109 = vmatmul.mubr.msk.f32.vlgmr.msra.gmra.mrb[6].mxu0 %vm729_vm2, %v716_v61 }
 0x1b8   :  { %1130 = vmatprep.mubr.msk.f32.mxu0 %vm1341_vm0, %v1342_v1  ;;  %1171 = vmatpush3.bf16.msra.mxu0 %v1170_v5 }
 0x1b9   :  { %1172 = vmatprep.subr.bf16.mxu0 %v1340_v0  ;;  %v1001_v0 = vld [vmem:[%s1550_s6] ss:$0 sm:$0xff] }
 0x1bc   :  { %1174 = vmatpush3.bf16.msra.mxu0 %v1173_v16 }
 0x28a   :  { %v799_v1 = vpop.f32.mrb[6].mxu0 }
 0x28b   :  { %v800_v12 = vadd.f32 %v799_v1, %v727_v11  ;;  %v1110_v13 = vpop.f32.mrb[7].mxu0 }
 0x28d   :  { %1120 = vmatmul.mubr.msk.f32.vlgmr.msra.gmra.mrb[10].mxu1 %vm729_vm2, %v800_v12 }
 0x360   :  { %v883_v17 = vpop.f32.mrb[10].mxu1 }
 0x361   :  { %v884_v18 = vadd.f32 %v1001_v0, %v883_v17  ;;  %v1121_v19 = vpop.f32.mrb[11].mxu1 }
 0x363   :  { %v887_v20 = vmax.f32 %v884_v18, 0.0 }
 0x365   :  { %1131 = vmatmul.mubr.msk.f32.vlgmr.msra.gmra.mrb[8].mxu0 %vm729_vm2, %v887_v20 }
 0x438   :  { %v968_v22 = vpop.f32.mrb[8].mxu0 }
 0x439   :  { %v969_v23 = vadd.f32 %v1003_v21, %v968_v22  ;;  %v1132_v24 = vpop.f32.mrb[9].mxu0 }
 0x43b   :  { %973 = vst.msk [vmem:[#allocation11] sm:$0x3] %vm972_vm3, %v969_v23 }
 0x43c   :  { %1314 = shalt.err (!%p1311_p2)
}
 0x43d   :  { %s1315_s18 = scalar_lea.hbm %s1553_s9, 32 }
 0x43e   :  { %p1316_p3 = scmp.ne.s32.totalorder %s1553_s9, %s1315_s18  ;;  %p1319_p4 = scmp.lt.u32.totalorder %s1315_s18, %s1553_s9 }
 0x440   :  { %p1321_p5 = pnand %p1319_p4, %p1316_p3 }
 0x442   :  { %1324 = shalt.err (!%p1321_p5)
}
 0x443   :  { %983 = dma.vmem_to_hbm [thread:$0]  %s981_s26, 32, %s1553_s9, [#allocation4]  }
 0x444   :  { %1331 = dma.done.wait [#allocation4], 32  }
 0x445   :  { %1332 = vsyncadd [#allocation4], 4294967264 }
 0x446   :  { %987 = vsyncpa [#allocation3], 1 }
 0x447   :  { %988 = vsyncpa [#allocation6], 1 }
 0x448   :  { %989 = vsyncpa [#allocation9], 1 }
 0x449   :  { %990 = vsyncpa [#allocation4], 1 }

</bundles_post_ra>
